<compile_context>
chip_gen: v7x
topology: tpu7x:2x2x1
jax: 0.10.0
libtpu: 0.0.40
codegen_flags: <defaults>
</compile_context>

<pallas_src>
import functools
import math

import jax
import jax.numpy as jnp
from jax import lax
from jax.experimental import pallas as pl
from jax.experimental.pallas import tpu as pltpu

EPS = 1e-5
LANE = 128
VMEM_LIMIT_BYTES = 32 * 1024 * 1024   # <= default scoped limit on v6e/v7x, raises v5e


def _round_up(v, m):
    return ((v + m - 1) // m) * m


def _compiler_params(sem):
    return pltpu.CompilerParams(dimension_semantics=sem,
                                vmem_limit_bytes=VMEM_LIMIT_BYTES)


def _pick_row_tile(rows, c_pad, *, max_tile_bytes=2 << 20, must_divide=False):
    """Largest multiple-of-8 row tile whose (tm, c_pad) f32 tile fits the budget."""
    cap = max(8, ((max_tile_bytes // (c_pad * 4)) // 8) * 8)
    cap = min(cap, 1024)
    if rows <= cap:
        return rows
    tm = cap
    if must_divide:
        while tm >= 8 and rows % tm:
            tm -= 8
        if tm < 8:
            return rows
    return tm


# --------------------------------------------------------------------- linear
def _linear_kernel(x_ref, w_ref, b_ref, o_ref, acc_ref, *, activation):
    @pl.when(pl.program_id(2) == 0)
    def _():
        acc_ref[...] = jnp.zeros_like(acc_ref)

    acc_ref[...] += jnp.dot(x_ref[...], w_ref[...],
                            preferred_element_type=jnp.float32)

    @pl.when(pl.program_id(2) == pl.num_programs(2) - 1)
    def _():
        y = acc_ref[...] + b_ref[...].astype(jnp.float32)
        if activation == "relu":
            y = jnp.maximum(y, 0.0)
        elif activation == "gelu":
            y = jax.nn.gelu(y)
        o_ref[...] = y.astype(o_ref.dtype)


def linear(x2d, w, b, *, activation=None):
    """y = activation(x2d @ w.T + b); w is (out, in) (torch layout), b is (out,)."""
    M, K = x2d.shape
    N = w.shape[0]
    wt = w.T                       # (K, N); one-time XLA transpose outside the kernel
    b2 = b.reshape(1, N)
    tm = M if M <= 256 else 256
    tn = N if N <= 256 else 256
    tk = K
    if K > 512:
        tk = next((t for t in (512, 384, 256, 128) if K % t == 0), K)
    grid = (pl.cdiv(M, tm), pl.cdiv(N, tn), pl.cdiv(K, tk))
    return pl.pallas_call(
        functools.partial(_linear_kernel, activation=activation),
        out_shape=jax.ShapeDtypeStruct((M, N), x2d.dtype),
        grid_spec=pltpu.PrefetchScalarGridSpec(
            num_scalar_prefetch=0,
            grid=grid,
            in_specs=[
                pl.BlockSpec((tm, tk), lambda i, j, k: (i, k)),
                pl.BlockSpec((tk, tn), lambda i, j, k: (k, j)),
                pl.BlockSpec((1, tn), lambda i, j, k: (0, j)),
            ],
            out_specs=pl.BlockSpec((tm, tn), lambda i, j, k: (i, j)),
            scratch_shapes=[pltpu.VMEM((tm, tn), jnp.float32)],
        ),
        compiler_params=_compiler_params(("parallel", "parallel", "arbitrary")),
    )(x2d, wt, b2)


# ------------------------------------------------------------------ attention
def _attention_kernel(q_ref, k_ref, v_ref, o_ref, *, scale):
    q = q_ref[...].astype(jnp.float32)            # (1, L, dh)
    k = k_ref[...].astype(jnp.float32)
    v = v_ref[...].astype(jnp.float32)
    s = jnp.einsum("bqd,bkd->bqk", q, k, preferred_element_type=jnp.float32) * scale
    m = jnp.max(s, axis=-1, keepdims=True)
    p = jnp.exp(s - m)
    p = p / jnp.sum(p, axis=-1, keepdims=True)
    o_ref[...] = jnp.einsum("bqk,bkd->bqd", p, v,
                            preferred_element_type=jnp.float32).astype(o_ref.dtype)


def self_attention(q, k, v, nhead):
    # TODO(synk): full (L, L) score matrix per (batch, head); switch to a flash-style
    # tiled online softmax for long sequence lengths.
    B, L, C = q.shape
    dh = C // nhead

    def heads(t):
        return t.reshape(B, L, nhead, dh).transpose(0, 2, 1, 3).reshape(B * nhead, L, dh)

    qh, kh, vh = heads(q), heads(k), heads(v)
    out = pl.pallas_call(
        functools.partial(_attention_kernel, scale=1.0 / math.sqrt(dh)),
        out_shape=jax.ShapeDtypeStruct((B * nhead, L, dh), q.dtype),
        grid_spec=pltpu.PrefetchScalarGridSpec(
            num_scalar_prefetch=0,
            grid=(B * nhead,),
            in_specs=[pl.BlockSpec((1, L, dh), lambda i: (i, 0, 0))] * 3,
            out_specs=pl.BlockSpec((1, L, dh), lambda i: (i, 0, 0)),
        ),
        compiler_params=_compiler_params(("parallel",)),
    )(qh, kh, vh)
    return out.reshape(B, nhead, L, dh).transpose(0, 2, 1, 3).reshape(B, L, C)


# -------------------------------------------------- fused residual add + norms
def _add_layernorm_kernel(x_ref, y_ref, w_ref, b_ref, o_ref, *, eps, c):
    z = x_ref[...].astype(jnp.float32) + y_ref[...].astype(jnp.float32)
    inv_c = 1.0 / c
    mean = jnp.sum(z, axis=-1, keepdims=True) * inv_c            # zero-padding safe
    var = jnp.sum(z * z, axis=-1, keepdims=True) * inv_c - mean * mean
    w = w_ref[...].astype(jnp.float32)
    b = b_ref[...].astype(jnp.float32)
    o_ref[...] = ((z - mean) * lax.rsqrt(var + eps) * w + b).astype(o_ref.dtype)


def _add_batch_stats_kernel(x_ref, y_ref, z_ref, s_ref, ss_ref):
    z = x_ref[...].astype(jnp.float32) + y_ref[...].astype(jnp.float32)
    z_ref[...] = z.astype(z_ref.dtype)

    @pl.when(pl.program_id(0) == 0)
    def _():
        s_ref[...] = jnp.zeros_like(s_ref)
        ss_ref[...] = jnp.zeros_like(ss_ref)

    s_ref[...] += jnp.sum(z, axis=0, keepdims=True)
    ss_ref[...] += jnp.sum(z * z, axis=0, keepdims=True)


def _batch_apply_kernel(z_ref, s_ref, ss_ref, w_ref, b_ref, o_ref, *, eps, n):
    z = z_ref[...].astype(jnp.float32)
    inv_n = 1.0 / n
    mean = s_ref[...] * inv_n
    var = ss_ref[...] * inv_n - mean * mean
    w = w_ref[...].astype(jnp.float32)
    b = b_ref[...].astype(jnp.float32)
    o_ref[...] = ((z - mean) * lax.rsqrt(var + eps) * w + b).astype(o_ref.dtype)


def _add_instancenorm_kernel(x_ref, y_ref, o_ref, *, eps, l):
    z = x_ref[...].astype(jnp.float32) + y_ref[...].astype(jnp.float32)  # (1, L, TC)
    inv_l = 1.0 / l
    mean = jnp.sum(z, axis=1, keepdims=True) * inv_l
    var = jnp.sum(z * z, axis=1, keepdims=True) * inv_l - mean * mean
    o_ref[...] = ((z - mean) * lax.rsqrt(var + eps)).astype(o_ref.dtype)


def add_norm(x, y, weight, bias, method, eps=EPS):
    """Fused residual-add + Norm (mirrors the PyTorch `Norm` wrapper). x, y: (B, L, C)."""
    B, L, C = x.shape
    c_pad = _round_up(C, LANE)          # lane-dense last dim (pad once in the wrapper)
    rows = B * L
    pad2 = ((0, 0), (0, c_pad - C))
    x2 = jnp.pad(x.reshape(rows, C), pad2)
    y2 = jnp.pad(y.reshape(rows, C), pad2)

    if method == "layer":
        w2 = jnp.pad(weight, (0, c_pad - C)).reshape(1, c_pad)
        b2 = jnp.pad(bias, (0, c_pad - C)).reshape(1, c_pad)
        tm = _pick_row_tile(rows, c_pad)
        out = pl.pallas_call(
            functools.partial(_add_layernorm_kernel, eps=eps, c=C),
            out_shape=jax.ShapeDtypeStruct((rows, c_pad), x.dtype),
            grid_spec=pltpu.PrefetchScalarGridSpec(
                num_scalar_prefetch=0,
                grid=(pl.cdiv(rows, tm),),
                in_specs=[
                    pl.BlockSpec((tm, c_pad), lambda i: (i, 0)),
                    pl.BlockSpec((tm, c_pad), lambda i: (i, 0)),
                    pl.BlockSpec((1, c_pad), lambda i: (0, 0)),
                    pl.BlockSpec((1, c_pad), lambda i: (0, 0)),
                ],
                out_specs=pl.BlockSpec((tm, c_pad), lambda i: (i, 0)),
            ),
            compiler_params=_compiler_params(("parallel",)),
        )(x2, y2, w2, b2)

    elif method == "batch":
        # TODO(synk): BatchNorm1d running_mean/running_var momentum update (stateful
        # buffers) is not reproduced; training-mode batch statistics are used.
        w2 = jnp.pad(weight, (0, c_pad - C)).reshape(1, c_pad)
        b2 = jnp.pad(bias, (0, c_pad - C)).reshape(1, c_pad)
        tm = _pick_row_tile(rows, c_pad, must_divide=True)
        grid = (pl.cdiv(rows, tm),)
        row_spec = pl.BlockSpec((tm, c_pad), lambda i: (i, 0))
        vec_spec = pl.BlockSpec((1, c_pad), lambda i: (0, 0))
        # Pass 1: residual add + per-channel sum / sum-of-squares accumulated across
        # row tiles into resident output blocks (grid axis "arbitrary").
        z2, s, ss = pl.pallas_call(
            _add_batch_stats_kernel,
            out_shape=(jax.ShapeDtypeStruct((rows, c_pad), x.dtype),
                       jax.ShapeDtypeStruct((1, c_pad), jnp.float32),
                       jax.ShapeDtypeStruct((1, c_pad), jnp.float32)),
            grid_spec=pltpu.PrefetchScalarGridSpec(
                num_scalar_prefetch=0,
                grid=grid,
                in_specs=[row_spec, row_spec],
                out_specs=[row_spec, vec_spec, vec_spec],
            ),
            compiler_params=_compiler_params(("arbitrary",)),
        )(x2, y2)
        # Pass 2: normalize + affine, tile-parallel.
        out = pl.pallas_call(
            functools.partial(_batch_apply_kernel, eps=eps, n=rows),
            out_shape=jax.ShapeDtypeStruct((rows, c_pad), x.dtype),
            grid_spec=pltpu.PrefetchScalarGridSpec(
                num_scalar_prefetch=0,
                grid=grid,
                in_specs=[row_spec, vec_spec, vec_spec, vec_spec, vec_spec],
                out_specs=row_spec,
            ),
            compiler_params=_compiler_params(("parallel",)),
        )(z2, s, ss, w2, b2)

    elif method == "instance":
        # InstanceNorm1d here has affine=False / track_running_stats=False.
        # Reduce over L per (batch, channel); reduction axis kept whole in-block,
        # channels tiled lane-dense, both grid axes parallel.
        x3 = x2.reshape(B, L, c_pad)
        y3 = y2.reshape(B, L, c_pad)
        tc = c_pad if c_pad <= 512 else 512
        out = pl.pallas_call(
            functools.partial(_add_instancenorm_kernel, eps=eps, l=L),
            out_shape=jax.ShapeDtypeStruct((B, L, c_pad), x.dtype),
            grid_spec=pltpu.PrefetchScalarGridSpec(
                num_scalar_prefetch=0,
                grid=(B, pl.cdiv(c_pad, tc)),
                in_specs=[pl.BlockSpec((1, L, tc), lambda b, c: (b, 0, c))] * 2,
                out_specs=pl.BlockSpec((1, L, tc), lambda b, c: (b, 0, c)),
            ),
            compiler_params=_compiler_params(("parallel", "parallel")),
        )(x3, y3)
        out = out.reshape(rows, c_pad)
    else:
        raise ValueError(f"unknown norm method: {method}")

    return out[:, :C].reshape(B, L, C)


# ----------------------------------------------------------------- full layer
def transformer_encoder_layer_forward(x, params, *, nhead, norm_method="layer",
                                      activation="relu"):
    """TransformerEncoderLayer.forward with norm_first=False (module default).
    TODO(synk): attn_mask / key_padding_mask and norm_first=True not supported;
    dropout/dropout1/dropout2 are identity (deterministic / eval-mode forward)."""
    B, L, C = x.shape
    x2 = x.reshape(B * L, C)

    # --- self-attention block -------------------------------------------------
    qkv = linear(x2, params["in_proj_w"], params["in_proj_b"]).reshape(B, L, 3 * C)
    q, k, v = jnp.split(qkv, 3, axis=-1)
    attn = self_attention(q, k, v, nhead)
    sa = linear(attn.reshape(B * L, C), params["out_proj_w"],
                params["out_proj_b"]).reshape(B, L, C)
    x = add_norm(x, sa, params.get("norm1_w"), params.get("norm1_b"), norm_method)

    # --- feed-forward block ---------------------------------------------------
    h = linear(x.reshape(B * L, C), params["lin1_w"], params["lin1_b"],
               activation=activation)
    ff = linear(h, params["lin2_w"], params["lin2_b"]).reshape(B, L, C)
    x = add_norm(x, ff, params.get("norm2_w"), params.get("norm2_b"), norm_method)
    return x


# --------------------------------------------------------- pure-JAX reference
def reference_forward(x, p, *, nhead, norm_method="layer", eps=EPS):
    hp = lax.Precision.HIGHEST
    B, L, C = x.shape
    dh = C // nhead

    def norm(z, w, b):
        if norm_method == "layer":
            axes = (-1,)
        elif norm_method == "batch":
            axes = (0, 1)
        else:
            axes = (1,)
        mean = jnp.mean(z, axis=axes, keepdims=True)
        var = jnp.mean((z - mean) ** 2, axis=axes, keepdims=True)
        out = (z - mean) * lax.rsqrt(var + eps)
        if norm_method != "instance":
            out = out * w + b
        return out

    qkv = jnp.dot(x, p["in_proj_w"].T, precision=hp) + p["in_proj_b"]
    q, k, v = jnp.split(qkv, 3, axis=-1)

    def heads(t):
        return t.reshape(B, L, nhead, dh).transpose(0, 2, 1, 3)

    qh, kh, vh = heads(q), heads(k), heads(v)
    s = jnp.einsum("bhqd,bhkd->bhqk", qh, kh, precision=hp) / math.sqrt(dh)
    a = jax.nn.softmax(s, axis=-1)
    o = jnp.einsum("bhqk,bhkd->bhqd", a, vh, precision=hp)
    o = o.transpose(0, 2, 1, 3).reshape(B, L, C)
    sa = jnp.dot(o, p["out_proj_w"].T, precision=hp) + p["out_proj_b"]
    x1 = norm(x + sa, p.get("norm1_w"), p.get("norm1_b"))
    h = jnp.maximum(jnp.dot(x1, p["lin1_w"].T, precision=hp) + p["lin1_b"], 0.0)
    ff = jnp.dot(h, p["lin2_w"].T, precision=hp) + p["lin2_b"]
    return norm(x1 + ff, p.get("norm2_w"), p.get("norm2_b"))


if __name__ == "__main__":
    key = jax.random.PRNGKey(0)
    B, L, D_MODEL, NHEAD, D_FF = 2, 8, 32, 4, 64
    keys = jax.random.split(key, 12)

    def init(k, shape, fan_in):
        return jax.random.normal(k, shape, dtype=jnp.float32) / math.sqrt(fan_in)

    x = jax.random.normal(keys[0], (B, L, D_MODEL), dtype=jnp.float32)
    params = {
        "in_proj_w": init(keys[1], (3 * D_MODEL, D_MODEL), D_MODEL),
        "in_proj_b": 0.1 * jax.random.normal(keys[2], (3 * D_MODEL,), jnp.float32),
        "out_proj_w": init(keys[3], (D_MODEL, D_MODEL), D_MODEL),
        "out_proj_b": 0.1 * jax.random.normal(keys[4], (D_MODEL,), jnp.float32),
        "lin1_w": init(keys[5], (D_FF, D_MODEL), D_MODEL),
        "lin1_b": 0.1 * jax.random.normal(keys[6], (D_FF,), jnp.float32),
        "lin2_w": init(keys[7], (D_MODEL, D_FF), D_FF),
        "lin2_b": 0.1 * jax.random.normal(keys[8], (D_MODEL,), jnp.float32),
        "norm1_w": 1.0 + 0.1 * jax.random.normal(keys[9], (D_MODEL,), jnp.float32),
        "norm1_b": 0.1 * jax.random.normal(keys[10], (D_MODEL,), jnp.float32),
        "norm2_w": 1.0 + 0.1 * jax.random.normal(keys[11], (D_MODEL,), jnp.float32),
        "norm2_b": 0.05 * jnp.ones((D_MODEL,), jnp.float32),
    }

    ok = True
    for method in ("layer", "batch", "instance"):
        out = jax.block_until_ready(
            transformer_encoder_layer_forward(x, params, nhead=NHEAD,
                                              norm_method=method))
        ref = reference_forward(x, params, nhead=NHEAD, norm_method=method)
        err = float(jnp.max(jnp.abs(out - ref)))
        if out.shape != (B, L, D_MODEL) or not bool(jnp.isfinite(err)) or err > 2e-3:
            ok = False
            print(f"method={method}: max abs err={err}, shape={out.shape}")

    if ok:
        print("KERNEL_OK")
</pallas_src>

<mosaic_0001>
module attributes {stable_mosaic.version = 11 : i64} {
  func.func @_linear_kernel(%arg0: i32, %arg1: i32, %arg2: i32, %arg3: memref<16x32xf32, #tpu.memory_space<vmem>>, %arg4: memref<32x96xf32, #tpu.memory_space<vmem>>, %arg5: memref<1x96xf32, #tpu.memory_space<vmem>>, %arg6: memref<16x96xf32, #tpu.memory_space<vmem>>, %arg7: memref<16x96xf32, #tpu.memory_space<vmem>>) attributes {dimension_semantics = [#tpu.dimension_semantics<parallel>, #tpu.dimension_semantics<parallel>, #tpu.dimension_semantics<arbitrary>], iteration_bounds = array<i64: 1, 1, 1>, scalar_prefetch = 0 : i64, scratch_operands = 1 : i64, tpu.core_type = #tpu.core_type<tc>, window_params = [{transform_indices = @transform_0, window_bounds = array<i64: 16, 32>}, {transform_indices = @transform_1, window_bounds = array<i64: 32, 96>}, {transform_indices = @transform_2, window_bounds = array<i64: 1, 96>}, {transform_indices = @transform_3, window_bounds = array<i64: 16, 96>}]} {
    %c0_i32 = arith.constant 0 : i32
    %0 = arith.cmpi eq, %arg2, %c0_i32 : i32
    %1 = arith.extui %0 : i1 to i32
    %c0_i32_0 = arith.constant 0 : i32
    %2 = arith.cmpi ne, %1, %c0_i32_0 : i32
    scf.if %2 {
      %cst_10 = arith.constant 0.000000e+00 : f32
      %12 = vector.broadcast %cst_10 : f32 to vector<16x96xf32>
      %c0_11 = arith.constant 0 : index
      %c0_12 = arith.constant 0 : index
      %13 = vector.load %arg7[%c0_11, %c0_12] : memref<16x96xf32, #tpu.memory_space<vmem>>, vector<16x96xf32>
      tpu.vector_store %arg7[%c0_11, %c0_12], %12 {strides = array<i32>} : memref<16x96xf32, #tpu.memory_space<vmem>>, vector<16x96xf32>,
    } else {
    }
    %c0 = arith.constant 0 : index
    %c0_1 = arith.constant 0 : index
    %3 = vector.load %arg7[%c0, %c0_1] : memref<16x96xf32, #tpu.memory_space<vmem>>, vector<16x96xf32>
    %c0_2 = arith.constant 0 : index
    %c0_3 = arith.constant 0 : index
    %4 = vector.load %arg3[%c0_2, %c0_3] : memref<16x32xf32, #tpu.memory_space<vmem>>, vector<16x32xf32>
    %c0_4 = arith.constant 0 : index
    %c0_5 = arith.constant 0 : index
    %5 = vector.load %arg4[%c0_4, %c0_5] : memref<32x96xf32, #tpu.memory_space<vmem>>, vector<32x96xf32>
    %cst = arith.constant dense<0.000000e+00> : vector<16x96xf32>
    %6 = tpu.matmul %4, %5, %cst {dimension_numbers = #tpu.dot_dimension_numbers<[1], [0], [0], [1], [0, 0, 1, 1], [], []>} : vector<16x32xf32>, vector<32x96xf32>, vector<16x96xf32> -> vector<16x96xf32>
    %7 = arith.addf %3, %6 : vector<16x96xf32>
    %c0_6 = arith.constant 0 : index
    %c0_7 = arith.constant 0 : index
    %8 = vector.load %arg7[%c0_6, %c0_7] : memref<16x96xf32, #tpu.memory_space<vmem>>, vector<16x96xf32>
    tpu.vector_store %arg7[%c0_6, %c0_7], %7 {strides = array<i32>} : memref<16x96xf32, #tpu.memory_space<vmem>>, vector<16x96xf32>,
    %c0_i32_8 = arith.constant 0 : i32
    %9 = arith.cmpi eq, %arg2, %c0_i32_8 : i32
    %10 = arith.extui %9 : i1 to i32
    %c0_i32_9 = arith.constant 0 : i32
    %11 = arith.cmpi ne, %10, %c0_i32_9 : i32
    scf.if %11 {
      %c0_10 = arith.constant 0 : index
      %c0_11 = arith.constant 0 : index
      %12 = vector.load %arg7[%c0_10, %c0_11] : memref<16x96xf32, #tpu.memory_space<vmem>>, vector<16x96xf32>
      %c0_12 = arith.constant 0 : index
      %c0_13 = arith.constant 0 : index
      %13 = vector.load %arg5[%c0_12, %c0_13] : memref<1x96xf32, #tpu.memory_space<vmem>>, vector<1x96xf32>
      %14 = vector.broadcast %13 : vector<1x96xf32> to vector<16x96xf32>
      %15 = arith.addf %12, %14 : vector<16x96xf32>
      %c0_14 = arith.constant 0 : index
      %c0_15 = arith.constant 0 : index
      %16 = vector.load %arg6[%c0_14, %c0_15] : memref<16x96xf32, #tpu.memory_space<vmem>>, vector<16x96xf32>
      tpu.vector_store %arg6[%c0_14, %c0_15], %15 {strides = array<i32>} : memref<16x96xf32, #tpu.memory_space<vmem>>, vector<16x96xf32>,
    } else {
    }
    return
  }
  func.func @transform_0(%arg0: i32, %arg1: i32, %arg2: i32) -> (i32, i32) {
    %c0_i32 = arith.constant 0 : i32
    return %arg0, %arg2 : i32, i32
  }
  func.func @transform_1(%arg0: i32, %arg1: i32, %arg2: i32) -> (i32, i32) {
    %c0_i32 = arith.constant 0 : i32
    return %arg2, %arg1 : i32, i32
  }
  func.func @transform_2(%arg0: i32, %arg1: i32, %arg2: i32) -> (i32, i32) {
    %c0_i32 = arith.constant 0 : i32
    %c0_i32_0 = arith.constant 0 : i32
    return %c0_i32, %arg1 : i32, i32
  }
  func.func @transform_3(%arg0: i32, %arg1: i32, %arg2: i32) -> (i32, i32) {
    %c0_i32 = arith.constant 0 : i32
    return %arg0, %arg1 : i32, i32
  }
}

</mosaic_0001>

<bundles_post_ra>
// kernel: tpu_custom_call.1
= control target key start
LH: loop header
LB: loop body
LE: loop exit
PB: predicated region body
PF: predicated region fallthrough
CT: control target
= control target key end

     0   :  { %8 = vsyncpa [#allocation4], 0  ;;  %s365_s0 = inlined_call_operand.hbm [shape: f32[16,32], index: 0, kind: input, shape index: {}]   ;;  %s366_s1 = inlined_call_operand.hbm [shape: f32[32,96], index: 1, kind: input, shape index: {}]   ;;  %s367_s2 = inlined_call_operand.vmem [shape: f32[1,96], index: 2, kind: input, shape index: {}]   ;;  %s368_s3 = inlined_call_operand.hbm [shape: f32[16,96], index: 3, kind: output, shape index: {}]  }
   0x1   :  { %9 = vsyncpa [#allocation7], 0 }
   0x2   :  { %10 = vsyncpa [#allocation5], 0  ;;  %s285_s12 = smov [#allocation3]   ;;  %s213_s16 = scalar_lea.hbm %s365_s0, 256 }
   0x3   :  { %s16_s13 = sshll.u32 %s285_s12, 4  ;;  %p214_p0 = scmp.ne.s32.totalorder %s365_s0, %s213_s16  ;;  %s17_s13 = int_to_ptr.vmem [resolvable:$true] %s16_s13 }
   0x4   :  { %p217_p1 = scmp.lt.u32.totalorder %s213_s16, %s365_s0 }
   0x6   :  { %p219_p2 = pnand %p217_p1, %p214_p0 }
   0x8   :  { %222 = shalt.err (!%p219_p2)
}
   0x9   :  { %s223_s21 = scalar_lea.vmem %s17_s13, 256  ;;  %p228_p4 = scmp.lt.s32.totalorder %s17_s13, %s17_s13 }
   0xa   :  { %p224_p3 = scmp.ne.s32.totalorder %s17_s13, %s223_s21  ;;  %p229_p5 = scmp.lt.s32.totalorder %s223_s21, %s223_s21 }
   0xc   :  { %p230_p6 = por %p229_p5, %p228_p4 }
   0xe   :  { %p231_p7 = pnand %p230_p6, %p224_p3 }
  0x10   :  { %234 = shalt.err (!%p231_p7)
}
  0x11   :  { %s286_s22 = smov 128   ;;  %s287_s23 = smov 8  }
  0x12   :  { %22 = dma.hbm_to_vmem [thread:$0]  %s365_s0, 256, %s17_s13, [#allocation4], %s286_s22, %s286_s22, %s287_s23  }
  0x13   :  { %s288_s26 = smov [#allocation6]   ;;  %s235_s30 = scalar_lea.hbm %s366_s1, 512 }
  0x14   :  { %s28_s27 = sshll.u32 %s288_s26, 4  ;;  %p236_p8 = scmp.ne.s32.totalorder %s366_s1, %s235_s30  ;;  %s29_s27 = int_to_ptr.vmem [resolvable:$true] %s28_s27 }
  0x15   :  { %p239_p9 = scmp.lt.u32.totalorder %s235_s30, %s366_s1 }
  0x17   :  { %p241_p10 = pnand %p239_p9, %p236_p8 }
  0x19   :  { %244 = shalt.err (!%p241_p10)
}
  0x1a   :  { %s245_s8 = scalar_lea.vmem %s29_s27, 512  ;;  %p250_p12 = scmp.lt.s32.totalorder %s29_s27, %s29_s27 }
  0x1b   :  { %p246_p11 = scmp.ne.s32.totalorder %s29_s27, %s245_s8  ;;  %p251_p13 = scmp.lt.s32.totalorder %s245_s8, %s245_s8 }
  0x1d   :  { %p252_p0 = por %p251_p13, %p250_p12 }
  0x1f   :  { %p253_p1 = pnand %p252_p0, %p246_p11 }
  0x21   :  { %256 = shalt.err (!%p253_p1)
}
  0x22   :  { %34 = dma.hbm_to_vmem [thread:$0]  %s366_s1, 512, %s29_s27, [#allocation7], %s286_s22, %s286_s22, %s287_s23  }
  0x23   :  { %279 = dma.done.wait [#allocation4], 256  }
  0x24   :  { %280 = vsyncadd [#allocation4], 4294967040 }
  0x25   :  { %281 = dma.done.wait [#allocation7], 512  }
  0x26   :  { %282 = vsyncadd [#allocation7], 4294966784  ;;  %vm47_vm0 = vcmask 785408   ;;  %v289_v0 = vmov 0.0   ;;  %vm58_vm1 = vcmask 261120   ;;  %v54_v1 = vld [vmem:[#allocation6] sm:$0xff] }
  0x27   :  { %49 = vst.msk [vmem:[#allocation2 + $0x8] sm:$0xff] %vm47_vm0, %v289_v0  ;;  %48 = vst.msk [vmem:[#allocation2] sm:$0xff] %vm47_vm0, %v289_v0  ;;  %v55_v2 = vld [vmem:[#allocation6 + $0x8] sm:$0xff]  ;;  %v56_v3 = vld [vmem:[#allocation6 + $0x10] sm:$0xff]  ;;  %s290_s11 = smov [#allocation8]  }
  0x28   :  { %v199_v4 = vpack.c.bf16 %v55_v2, %v54_v1  ;;  %v57_v5 = vld [vmem:[#allocation6 + $0x18] sm:$0xff]  ;;  %v52_v6 = vld [vmem:[#allocation3] sm:$0xff]  ;;  %v181_v15 = vld [vmem:[%s367_s2] ss:$0 sm:$0xff]  ;;  %s166_s12 = sshll.u32 %s290_s11, 4  ;;  %s167_s12 = int_to_ptr.vmem [resolvable:$true] %s166_s12 }
  0x29   :  { %v203_v7 = vpack.c.bf16 %v57_v5, %v56_v3  ;;  %196 = vmatprep.mubr.msk.f32.mxu0 %vm58_vm1, %v52_v6  ;;  %v53_v8 = vld [vmem:[#allocation3 + $0x8] sm:$0xff]  ;;  %s257_s13 = scalar_lea.vmem %s167_s12, 256  ;;  %p262_p3 = scmp.lt.s32.totalorder %s167_s12, %s167_s12 }
  0x2a   :  { %200 = vmatprep.subr.bf16.mxu0 %v199_v4  ;;  %p258_p2 = scmp.ne.s32.totalorder %s167_s12, %s257_s13  ;;  %p263_p4 = scmp.lt.s32.totalorder %s257_s13, %s257_s13 }
  0x2b   :  { %202 = vmatpush3.bf16.msra.mxu0 %v199_v4 }
  0x2c   :  { %204 = vmatprep.subr.bf16.mxu0 %v203_v7  ;;  %p264_p5 = por %p263_p4, %p262_p3 }
  0x2e   :  { %v51_v9 = vld [vmem:[#allocation2 + $0x8] sm:$0xff]  ;;  %v50_v10 = vld [vmem:[#allocation2] sm:$0xff]  ;;  %p265_p6 = pnand %p264_p5, %p258_p2 }
  0x2f   :  { %206 = vmatpush3.bf16.msra.mxu0 %v203_v7 }
  0x32   :  { %197 = vmatmul.mubr.msk.f32.vlgmr.msra.gmra.mrb[0].mxu0 %vm58_vm1, %v53_v8 }
 0x105   :  { %v198_v11 = vpop.f32.mrb[0].mxu0 }
 0x106   :  { %v141_v12 = vadd.f32 %v198_v11, %v51_v9  ;;  %v131_v13 = vpop.f32.mrb[1].mxu0 }
 0x107   :  { %v140_v14 = vadd.f32 %v131_v13, %v50_v10 }
 0x108   :  { %144 = vst.msk [vmem:[#allocation2 + $0x8] sm:$0xff] %vm47_vm0, %v141_v12 }
 0x109   :  { %143 = vst.msk [vmem:[#allocation2] sm:$0xff] %vm47_vm0, %v140_v14 }
 0x10f   :  { %v149_v16 = vld [vmem:[#allocation2 + $0x8] sm:$0xff] }
 0x110   :  { %v148_v17 = vld [vmem:[#allocation2] sm:$0xff]  ;;  %v158_v18 = vadd.f32 %v181_v15, %v149_v16 }
 0x111   :  { %v157_v19 = vadd.f32 %v181_v15, %v148_v17 }
 0x112   :  { %160 = vst.msk [vmem:[#allocation8 + $0x8] sm:$0xff] %vm47_vm0, %v158_v18 }
 0x113   :  { %159 = vst.msk [vmem:[#allocation8] sm:$0xff] %vm47_vm0, %v157_v19 }
 0x114   :  { %268 = shalt.err (!%p265_p6)
}
 0x115   :  { %s269_s15 = scalar_lea.hbm %s368_s3, 256 }
 0x116   :  { %p270_p7 = scmp.ne.s32.totalorder %s368_s3, %s269_s15  ;;  %p273_p8 = scmp.lt.u32.totalorder %s269_s15, %s368_s3 }
 0x118   :  { %p275_p9 = pnand %p273_p8, %p270_p7 }
 0x11a   :  { %278 = shalt.err (!%p275_p9)
}
 0x11b   :  { %172 = dma.vmem_to_hbm [thread:$0]  %s167_s12, 256, %s368_s3, [#allocation5], %s286_s22, %s286_s22, %s287_s23  }
 0x11c   :  { %283 = dma.done.wait [#allocation5], 256  }
 0x11d   :  { %284 = vsyncadd [#allocation5], 4294967040 }
 0x11e   :  { %176 = vsyncpa [#allocation4], 1 }
 0x11f   :  { %177 = vsyncpa [#allocation7], 1 }
 0x120   :  { %178 = vsyncpa [#allocation5], 1 }

</bundles_post_ra>
